<compile_context>
chip_gen: v5e
topology: v5e:2x2
jax: 0.10.0
libtpu: 0.0.40
codegen_flags: <defaults>
</compile_context>

<pallas_src>
import functools

import jax
import jax.numpy as jnp
from jax.experimental import pallas as pl
from jax.experimental.pallas import tpu as pltpu

BN_EPS = 1e-5
LANE = 128  # TPU lane width; all hidden/output dims are zero-padded to this


def _round_up(n, m):
    return ((n + m - 1) // m) * m


def _actor_kernel(x_ref, slab_ref, o_ref, *, state_size, r2, r3, rv, inv_b):
    x = x_ref[...]  # (B, state_size)

    # Static views into the single parameter slab (zero-cost slices).
    w1 = slab_ref[0:state_size, :]        # (state_size, 128)
    w2 = slab_ref[r2:r2 + LANE, :]        # (128, 128)
    w3 = slab_ref[r3:r3 + LANE, :]        # (128, 128)
    gamma = slab_ref[rv:rv + 1, :]        # (1, 128)
    beta = slab_ref[rv + 1:rv + 2, :]     # (1, 128)
    b2 = slab_ref[rv + 2:rv + 3, :]       # (1, 128)
    b3 = slab_ref[rv + 3:rv + 4, :]       # (1, 128)

    # fc1 — bias intentionally omitted (cancelled by train-mode BN mean sub).
    h1 = jnp.dot(x, w1, preferred_element_type=jnp.float32)  # (B, 128)

    # BatchNorm1d (training mode, biased batch stats): one fused sublane
    # reduction over [h1 | h1*h1], then a single FMA per element.
    both = jnp.concatenate([h1, h1 * h1], axis=1)   # (B, 256)
    sums = jnp.sum(both, axis=0, keepdims=True)     # (1, 256)
    s = sums[:, :LANE]
    ss = sums[:, LANE:]
    mean = s * inv_b
    var = jnp.maximum(ss * inv_b - mean * mean, 0.0)  # clamp f32 cancellation
    scale = gamma * jax.lax.rsqrt(var + BN_EPS)
    shift = beta - mean * scale
    h1 = jnp.maximum(h1 * scale + shift, 0.0)       # BN + ReLU, full vregs

    # fc2 + ReLU (lane-dense; padded columns stay exactly 0).
    h2 = jnp.maximum(
        jnp.dot(h1, w2, preferred_element_type=jnp.float32) + b2, 0.0)

    # fc3 + tanh, lane-dense full-tile store.
    o_ref[...] = jnp.tanh(
        jnp.dot(h2, w3, preferred_element_type=jnp.float32) + b3)


def pack_actor_params(params):
    """One-time packing of PyTorch-style params into a single kernel slab.

    Layout (rows, all lane width 128, sublane offsets multiples of 8):
      [0 : s_pad)            w1  (in=state_size rows used, out padded to 128)
      [s_pad : s_pad+128)    w2  (in/out zero-padded to 128)
      [s_pad+128 : s_pad+256) w3 (in/out zero-padded to 128)
      [s_pad+256 : s_pad+264) gamma / beta / b2 / b3 rows (+ 4 zero rows)

    NOTE: b1 is dropped — valid ONLY while BatchNorm uses training-mode batch
    statistics (it cancels against the mean subtraction).  If an eval path
    with running stats is added, b1 must be reinstated.
    """
    (w1, b1, gamma, beta, w2, b2, w3, b3) = params
    del b1
    state_size, fc1_units = w1.shape
    fc2_units = w2.shape[1]
    action_size = w3.shape[1]
    # TODO(synk): widths > 128 (e.g. DDPG 400/300 defaults) need multi-tile
    # lane padding / a feature grid; not implemented for this toy-size kernel.
    assert fc1_units <= LANE and fc2_units <= LANE and action_size <= LANE

    s_pad = _round_up(state_size, 8)
    r2 = s_pad
    r3 = r2 + LANE
    rv = r3 + LANE
    n_rows = rv + 8

    slab = jnp.zeros((n_rows, LANE), jnp.float32)
    slab = slab.at[0:state_size, 0:fc1_units].set(w1)
    slab = slab.at[r2:r2 + fc1_units, 0:fc2_units].set(w2)
    slab = slab.at[r3:r3 + fc2_units, 0:action_size].set(w3)
    slab = slab.at[rv, 0:fc1_units].set(gamma[0])
    slab = slab.at[rv + 1, 0:fc1_units].set(beta[0])
    slab = slab.at[rv + 2, 0:fc2_units].set(b2[0])
    slab = slab.at[rv + 3, 0:action_size].set(b3[0])
    return slab, action_size


@functools.partial(jax.jit, static_argnames=("action_size",))
def actor_forward(x, slab, action_size):
    """Jitted forward: pallas_call + fused output slice."""
    B, state_size = x.shape
    s_pad = _round_up(state_size, 8)
    r2 = s_pad
    r3 = r2 + LANE
    rv = r3 + LANE

    kernel = functools.partial(
        _actor_kernel,
        state_size=state_size, r2=r2, r3=r3, rv=rv, inv_b=1.0 / B)

    full = pl.BlockSpec(memory_space=pltpu.VMEM)  # whole-array blocks in VMEM
    flops = 2 * B * (state_size * LANE + LANE * LANE + LANE * LANE)
    bytes_accessed = 4 * (x.size + slab.size + B * LANE)

    out = pl.pallas_call(
        kernel,
        out_shape=jax.ShapeDtypeStruct((B, LANE), jnp.float32),
        in_specs=[full, full],
        out_specs=full,
        cost_estimate=pl.CostEstimate(
            flops=flops,
            transcendentals=B * LANE,       # tanh (rsqrt is negligible)
            bytes_accessed=bytes_accessed),
    )(x, slab)
    return out[:, :action_size]


def init_actor_params(key, state_size, action_size, fc1_units, fc2_units):
    """Deterministic init matching the PyTorch module's reset_parameters():
    fc1/fc2 weights ~ U(-1/sqrt(fan_in), 1/sqrt(fan_in)), fc3 ~ U(-3e-3, 3e-3),
    biases keep PyTorch Linear default U(-1/sqrt(fan_in), 1/sqrt(fan_in)),
    BatchNorm gamma=1, beta=0.  Weights stored as (in, out)."""
    ks = jax.random.split(key, 6)

    def u(k, shape, lim):
        return jax.random.uniform(k, shape, jnp.float32, -lim, lim)

    lim1 = 1.0 / jnp.sqrt(state_size)
    lim2 = 1.0 / jnp.sqrt(fc1_units)
    lim3 = 1.0 / jnp.sqrt(fc2_units)

    w1 = u(ks[0], (state_size, fc1_units), lim1)
    b1 = u(ks[1], (1, fc1_units), lim1)
    gamma = jnp.ones((1, fc1_units), jnp.float32)
    beta = jnp.zeros((1, fc1_units), jnp.float32)
    w2 = u(ks[2], (fc1_units, fc2_units), lim2)
    b2 = u(ks[3], (1, fc2_units), lim2)
    w3 = u(ks[4], (fc2_units, action_size), 3e-3)
    b3 = u(ks[5], (1, action_size), lim3)
    return (w1, b1, gamma, beta, w2, b2, w3, b3)


def actor_forward_ref(x, params):
    """Pure-JAX reference (keeps the fc1 bias, proving the in-kernel
    cancellation under train-mode BatchNorm is numerically harmless)."""
    (w1, b1, gamma, beta, w2, b2, w3, b3) = params
    h1 = x @ w1 + b1
    mean = jnp.mean(h1, axis=0, keepdims=True)
    var = jnp.mean((h1 - mean) ** 2, axis=0, keepdims=True)
    h1 = jax.nn.relu((h1 - mean) / jnp.sqrt(var + BN_EPS) * gamma + beta)
    h2 = jax.nn.relu(h1 @ w2 + b2)
    return jnp.tanh(h2 @ w3 + b3)


if __name__ == "__main__":
    state_size, action_size = 16, 4
    fc1_units, fc2_units = 32, 32
    batch = 8

    key = jax.random.PRNGKey(0)
    kx, kp = jax.random.split(key)
    x = jax.random.normal(kx, (batch, state_size), jnp.float32)
    params = init_actor_params(kp, state_size, action_size, fc1_units, fc2_units)
    slab, act = pack_actor_params(params)

    out = actor_forward(x, slab, action_size=act)
    out = jax.block_until_ready(out)

    ref = actor_forward_ref(x, params)
    assert out.shape == (batch, action_size)
    assert jnp.allclose(out, ref, atol=2e-5, rtol=1e-4), float(
        jnp.max(jnp.abs(out - ref)))

    print("KERNEL_OK")
</pallas_src>

<mosaic_0001>
module attributes {stable_mosaic.version = 11 : i64} {
  func.func @_actor_kernel(%arg0: memref<8x16xf32, #tpu.memory_space<vmem>>, %arg1: memref<280x128xf32, #tpu.memory_space<vmem>>, %arg2: memref<8x128xf32, #tpu.memory_space<vmem>>) attributes {dimension_semantics = [], scalar_prefetch = 0 : i64, scratch_operands = 0 : i64, tpu.core_type = #tpu.core_type<tc>} {
    %c0 = arith.constant 0 : index
    %c0_0 = arith.constant 0 : index
    %0 = vector.load %arg0[%c0, %c0_0] : memref<8x16xf32, #tpu.memory_space<vmem>>, vector<8x16xf32>
    %c0_1 = arith.constant 0 : index
    %c0_2 = arith.constant 0 : index
    %1 = vector.load %arg1[%c0_1, %c0_2] : memref<280x128xf32, #tpu.memory_space<vmem>>, vector<16x128xf32>
    %c16 = arith.constant 16 : index
    %c0_3 = arith.constant 0 : index
    %2 = vector.load %arg1[%c16, %c0_3] : memref<280x128xf32, #tpu.memory_space<vmem>>, vector<128x128xf32>
    %c144 = arith.constant 144 : index
    %c0_4 = arith.constant 0 : index
    %3 = vector.load %arg1[%c144, %c0_4] : memref<280x128xf32, #tpu.memory_space<vmem>>, vector<128x128xf32>
    %c272 = arith.constant 272 : index
    %c0_5 = arith.constant 0 : index
    %4 = vector.load %arg1[%c272, %c0_5] : memref<280x128xf32, #tpu.memory_space<vmem>>, vector<1x128xf32>
    %c273 = arith.constant 273 : index
    %c0_6 = arith.constant 0 : index
    %5 = vector.load %arg1[%c273, %c0_6] : memref<280x128xf32, #tpu.memory_space<vmem>>, vector<1x128xf32>
    %c274 = arith.constant 274 : index
    %c0_7 = arith.constant 0 : index
    %6 = vector.load %arg1[%c274, %c0_7] : memref<280x128xf32, #tpu.memory_space<vmem>>, vector<1x128xf32>
    %c275 = arith.constant 275 : index
    %c0_8 = arith.constant 0 : index
    %7 = vector.load %arg1[%c275, %c0_8] : memref<280x128xf32, #tpu.memory_space<vmem>>, vector<1x128xf32>
    %cst = arith.constant dense<0.000000e+00> : vector<8x128xf32>
    %8 = tpu.matmul %0, %1, %cst {dimension_numbers = #tpu.dot_dimension_numbers<[1], [0], [0], [1], [0, 0, 1, 1], [], []>} : vector<8x16xf32>, vector<16x128xf32>, vector<8x128xf32> -> vector<8x128xf32>
    %9 = arith.mulf %8, %8 : vector<8x128xf32>
    %10 = tpu.concatenate %8, %9 in 1 : vector<8x128xf32>, vector<8x128xf32> -> vector<8x256xf32>
    %cst_9 = arith.constant dense<0.000000e+00> : vector<256xf32>
    %11 = vector.multi_reduction <add>, %10, %cst_9 [0] : vector<8x256xf32> to vector<256xf32>
    %12 = vector.shape_cast %11 : vector<256xf32> to vector<1x256xf32>
    %13 = vector.extract_strided_slice %12 {offsets = [0, 0], sizes = [1, 128], strides = [1, 1]} : vector<1x256xf32> to vector<1x128xf32>
    %14 = vector.extract_strided_slice %12 {offsets = [0, 128], sizes = [1, 128], strides = [1, 1]} : vector<1x256xf32> to vector<1x128xf32>
    %cst_10 = arith.constant 1.250000e-01 : f32
    %15 = vector.broadcast %cst_10 : f32 to vector<1x128xf32>
    %16 = arith.mulf %13, %15 : vector<1x128xf32>
    %cst_11 = arith.constant 1.250000e-01 : f32
    %17 = vector.broadcast %cst_11 : f32 to vector<1x128xf32>
    %18 = arith.mulf %14, %17 : vector<1x128xf32>
    %19 = arith.mulf %16, %16 : vector<1x128xf32>
    %20 = arith.subf %18, %19 : vector<1x128xf32>
    %cst_12 = arith.constant 0.000000e+00 : f32
    %21 = vector.broadcast %cst_12 : f32 to vector<1x128xf32>
    %22 = arith.maximumf %20, %21 : vector<1x128xf32>
    %cst_13 = arith.constant 9.99999974E-6 : f32
    %23 = vector.broadcast %cst_13 : f32 to vector<1x128xf32>
    %24 = arith.addf %22, %23 : vector<1x128xf32>
    %25 = math.rsqrt %24 : vector<1x128xf32>
    %26 = arith.mulf %4, %25 : vector<1x128xf32>
    %27 = arith.mulf %16, %26 : vector<1x128xf32>
    %28 = arith.subf %5, %27 : vector<1x128xf32>
    %29 = vector.broadcast %26 : vector<1x128xf32> to vector<8x128xf32>
    %30 = arith.mulf %8, %29 : vector<8x128xf32>
    %31 = vector.broadcast %28 : vector<1x128xf32> to vector<8x128xf32>
    %32 = arith.addf %30, %31 : vector<8x128xf32>
    %cst_14 = arith.constant 0.000000e+00 : f32
    %33 = vector.broadcast %cst_14 : f32 to vector<8x128xf32>
    %34 = arith.maximumf %32, %33 : vector<8x128xf32>
    %cst_15 = arith.constant dense<0.000000e+00> : vector<8x128xf32>
    %35 = tpu.matmul %34, %2, %cst_15 {dimension_numbers = #tpu.dot_dimension_numbers<[1], [0], [0], [1], [0, 0, 1, 1], [], []>} : vector<8x128xf32>, vector<128x128xf32>, vector<8x128xf32> -> vector<8x128xf32>
    %36 = vector.broadcast %6 : vector<1x128xf32> to vector<8x128xf32>
    %37 = arith.addf %35, %36 : vector<8x128xf32>
    %cst_16 = arith.constant 0.000000e+00 : f32
    %38 = vector.broadcast %cst_16 : f32 to vector<8x128xf32>
    %39 = arith.maximumf %37, %38 : vector<8x128xf32>
    %cst_17 = arith.constant dense<0.000000e+00> : vector<8x128xf32>
    %40 = tpu.matmul %39, %3, %cst_17 {dimension_numbers = #tpu.dot_dimension_numbers<[1], [0], [0], [1], [0, 0, 1, 1], [], []>} : vector<8x128xf32>, vector<128x128xf32>, vector<8x128xf32> -> vector<8x128xf32>
    %41 = vector.broadcast %7 : vector<1x128xf32> to vector<8x128xf32>
    %42 = arith.addf %40, %41 : vector<8x128xf32>
    %43 = math.tanh %42 : vector<8x128xf32>
    %c0_18 = arith.constant 0 : index
    %c0_19 = arith.constant 0 : index
    %44 = vector.load %arg2[%c0_18, %c0_19] : memref<8x128xf32, #tpu.memory_space<vmem>>, vector<8x128xf32>
    tpu.vector_store %arg2[%c0_18, %c0_19], %43 {strides = array<i32>} : memref<8x128xf32, #tpu.memory_space<vmem>>, vector<8x128xf32>,
    return
  }
}

</mosaic_0001>

<bundles_post_ra>
// kernel: actor_forward.1
= control target key start
LH: loop header
LB: loop body
LE: loop exit
PB: predicated region body
PF: predicated region fallthrough
CT: control target
= control target key end

     0   :  { %7 = vsyncpa [#allocation3], 0  ;;  %s290_s0 = inlined_call_operand.hbm [shape: f32[8,16], index: 0, kind: input, shape index: {}]   ;;  %s291_s1 = inlined_call_operand.hbm [shape: f32[280,128], index: 1, kind: input, shape index: {}]   ;;  %s292_s2 = inlined_call_operand.vmem [shape: f32[8,128], index: 2, kind: output, shape index: {}]  }
   0x1   :  { %s14_s11 = sshll.u32 %s290_s0, 4  ;;  %s15_s11 = int_to_ptr.hbm [resolvable:$true] %s14_s11 }
   0x2   :  { %8 = vsyncpa [#allocation5], 0  ;;  %s255_s12 = smov [#allocation2]   ;;  %s24_s16 = sshll.u32 %s291_s1, 4  ;;  %s25_s16 = int_to_ptr.hbm [resolvable:$true] %s24_s16 }
   0x3   :  { %s16_s13 = sshll.u32 %s255_s12, 4  ;;  %s256_s17 = smov [#allocation4]   ;;  %s17_s13 = int_to_ptr.vmem [resolvable:$true] %s16_s13 }
   0x4   :  { %19 = dma.hbm_to_vmem [thread:$0]  %s15_s11, 128, %s17_s13, [#allocation3]  }
   0x5   :  { %s26_s18 = sshll.u32 %s256_s17, 4  ;;  %s257_s19 = smov 128   ;;  %s27_s18 = int_to_ptr.vmem [resolvable:$true] %s26_s18 }
   0x6   :  { %s258_s20 = smov 8  }
   0x7   :  { %32 = dma.hbm_to_vmem [thread:$0]  %s25_s16, 4480, %s27_s18, [#allocation5], %s257_s19, %s257_s19, %s258_s20  }
   0x8   :  { %251 = dma.done.wait [#allocation3], 128  }
   0x9   :  { %252 = vsyncadd [#allocation3], 4294967168 }
   0xa   :  { %253 = dma.done.wait [#allocation5], 4480  }
   0xb   :  { %254 = vsyncadd [#allocation5], 4294962816  ;;  %v43_v0 = vld [vmem:[#allocation4 + $0x8] sm:$0xff]  ;;  %v42_v1 = vld [vmem:[#allocation4] sm:$0xff]  ;;  %vm80_vm0 = vcmask 130048  }
   0xc   :  { %98 = vmatpush.msra.mxu0 %v43_v0  ;;  %v41_v2 = vld [vmem:[#allocation2] sm:$0xff]  ;;  %v59_v3 = vld [vmem:[#allocation4 + $0x88] sm:$0xff]  ;;  %v58_v4 = vld [vmem:[#allocation4 + $0x80] sm:$0xff] }
   0xd   :  { %142 = vmatpush.msra.mxu1 %v59_v3  ;;  %v57_v5 = vld [vmem:[#allocation4 + $0x78] sm:$0xff]  ;;  %v56_v6 = vld [vmem:[#allocation4 + $0x70] sm:$0xff]  ;;  %v55_v7 = vld [vmem:[#allocation4 + $0x68] sm:$0xff] }
   0xe   :  { %99 = vmatpush.msra.mxu0 %v42_v1  ;;  %v54_v8 = vld [vmem:[#allocation4 + $0x60] sm:$0xff]  ;;  %v53_v12 = vld [vmem:[#allocation4 + $0x58] sm:$0xff]  ;;  %v52_v15 = vld [vmem:[#allocation4 + $0x50] sm:$0xff] }
   0xf   :  { %192 = vmatmul.msk.f32.vlgmr.msra.gmra.mxu0 %vm80_vm0, %v41_v2  ;;  %143 = vmatpush.msra.mxu1 %v58_v4  ;;  %v51_v18 = vld [vmem:[#allocation4 + $0x48] sm:$0xff]  ;;  %v50_v21 = vld [vmem:[#allocation4 + $0x40] sm:$0xff]  ;;  %v49_v24 = vld [vmem:[#allocation4 + $0x38] sm:$0xff] }
  0x10   :  { %v48_v27 = vld [vmem:[#allocation4 + $0x30] sm:$0xff]  ;;  %v47_v30 = vld [vmem:[#allocation4 + $0x28] sm:$0xff]  ;;  %v46_v31 = vld [vmem:[#allocation4 + $0x20] sm:$0xff] }
  0x11   :  { %144 = vmatpush.msra.mxu1 %v57_v5  ;;  %v45_v34 = vld [vmem:[#allocation4 + $0x18] sm:$0xff]  ;;  %v44_v36 = vld [vmem:[#allocation4 + $0x10] sm:$0xff]  ;;  %v75_v39 = vld [vmem:[#allocation4 + $0x108] sm:$0xff] }
  0x12   :  { %v74_v40 = vld [vmem:[#allocation4 + $0x100] sm:$0xff]  ;;  %164 = vmatpush.msra.mxu2 %v75_v39  ;;  %v73_v41 = vld [vmem:[#allocation4 + $0xf8] sm:$0xff]  ;;  %v72_v42 = vld [vmem:[#allocation4 + $0xf0] sm:$0xff] }
  0x13   :  { %145 = vmatpush.msra.mxu1 %v56_v6  ;;  %v71_v43 = vld [vmem:[#allocation4 + $0xe8] sm:$0xff]  ;;  %v70_v45 = vld [vmem:[#allocation4 + $0xe0] sm:$0xff]  ;;  %v69_v47 = vld [vmem:[#allocation4 + $0xd8] sm:$0xff] }
  0x14   :  { %165 = vmatpush.msra.mxu2 %v74_v40  ;;  %v68_v49 = vld [vmem:[#allocation4 + $0xd0] sm:$0xff]  ;;  %v67_v51 = vld [vmem:[#allocation4 + $0xc8] sm:$0xff]  ;;  %v66_v53 = vld [vmem:[#allocation4 + $0xc0] sm:$0xff] }
  0x15   :  { %146 = vmatpush.msra.mxu1 %v55_v7  ;;  %v76_v54 = vld [vmem:[#allocation4 + $0x110] sm:$0x1]  ;;  %v65_v56 = vld [vmem:[#allocation4 + $0xb8] sm:$0xff]  ;;  %v77_v60 = vld [vmem:[#allocation4 + $0x111] sm:$0x1] }
  0x16   :  { %166 = vmatpush.msra.mxu2 %v73_v41  ;;  %v64_v59 = vld [vmem:[#allocation4 + $0xb0] sm:$0xff]  ;;  %v63_v63 = vld [vmem:[#allocation4 + $0xa8] sm:$0xff]  ;;  %v62_v5 = vld [vmem:[#allocation4 + $0xa0] sm:$0xff] }
  0x17   :  { %147 = vmatpush.msra.mxu1 %v54_v8  ;;  %v61_v6 = vld [vmem:[#allocation4 + $0x98] sm:$0xff]  ;;  %v60_v7 = vld [vmem:[#allocation4 + $0x90] sm:$0xff] }
  0x18   :  { %167 = vmatpush.msra.mxu2 %v72_v42  ;;  %v197_v8 = vld [vmem:[#allocation4 + $0x112] ss:$0 sm:$0xff] }
  0x19   :  { %148 = vmatpush.msra.mxu1 %v53_v12 }
  0x1a   :  { %168 = vmatpush.msra.mxu2 %v71_v43 }
  0x1b   :  { %149 = vmatpush.msra.mxu1 %v52_v15 }
  0x1c   :  { %169 = vmatpush.msra.mxu2 %v70_v45 }
  0x1d   :  { %150 = vmatpush.msra.mxu1 %v51_v18 }
  0x1e   :  { %170 = vmatpush.msra.mxu2 %v69_v47 }
  0x1f   :  { %151 = vmatpush.msra.mxu1 %v50_v21 }
  0x20   :  { %171 = vmatpush.msra.mxu2 %v68_v49 }
  0x21   :  { %152 = vmatpush.msra.mxu1 %v49_v24 }
  0x22   :  { %172 = vmatpush.msra.mxu2 %v67_v51 }
  0x23   :  { %153 = vmatpush.msra.mxu1 %v48_v27 }
  0x24   :  { %173 = vmatpush.msra.mxu2 %v66_v53 }
  0x25   :  { %154 = vmatpush.msra.mxu1 %v47_v30 }
  0x26   :  { %174 = vmatpush.msra.mxu2 %v65_v56 }
  0x27   :  { %155 = vmatpush.msra.mxu1 %v46_v31 }
  0x28   :  { %175 = vmatpush.msra.mxu2 %v64_v59 }
  0x29   :  { %156 = vmatpush.msra.mxu1 %v45_v34 }
  0x2a   :  { %176 = vmatpush.msra.mxu2 %v63_v63 }
  0x2b   :  { %157 = vmatpush.msra.mxu1 %v44_v36 }
  0x2c   :  { %177 = vmatpush.msra.mxu2 %v62_v5 }
  0x2e   :  { %178 = vmatpush.msra.mxu2 %v61_v6 }
  0x30   :  { %179 = vmatpush.msra.mxu2 %v60_v7 }
  0x8c   :  { %v280_v9 = vpop.f32.mrf.mxu0 }
  0x8d   :  { %v104_v10 = vmul.f32 %v280_v9, %v280_v9  ;;  %v105_v11 = vrot.slane %v280_v9, 4 }
  0x8f   :  { %v106_v13 = vadd.f32 %v105_v11, %v280_v9  ;;  %v111_v14 = vrot.slane %v104_v10, 4 }
  0x91   :  { %v107_v16 = vrot.slane %v106_v13, 2  ;;  %v112_v17 = vadd.f32 %v111_v14, %v104_v10 }
  0x93   :  { %v108_v19 = vadd.f32 %v107_v16, %v106_v13  ;;  %v113_v20 = vrot.slane %v112_v17, 2  ;;  %v198_v13 = vld [vmem:[#allocation4 + $0x113] ss:$0 sm:$0xff] }
  0x95   :  { %v109_v22 = vrot.slane %v108_v19, 1  ;;  %v114_v23 = vadd.f32 %v113_v20, %v112_v17 }
  0x97   :  { %v110_v25 = vadd.f32 %v109_v22, %v108_v19  ;;  %v115_v26 = vrot.slane %v114_v23, 1 }
  0x99   :  { %v116_v28 = vadd.f32 %v115_v26, %v114_v23  ;;  %v117_v29 = vmul.f32 0.125, %v110_v25 }
  0x9b   :  { %v118_v32 = vmul.f32 0.125, %v116_v28  ;;  %v119_v33 = vmul.f32 %v117_v29, %v117_v29 }
  0x9d   :  { %v120_v35 = vsub.f32 %v118_v32, %v119_v33 }
  0x9f   :  { %v121_v37 = vmax.f32 %v120_v35, 0.0 }
  0xa1   :  { %v122_v38 = vadd.f32 1e-05, %v121_v37 }
  0xa3   :  { %199 = vrsqrt.f32 %v122_v38  ;;  %vm129_vm2 = vweird.f32 %v122_v38 }
  0xa9   :  { %v200_v44 = vpop.eup %199 }
  0xaa   :  { %v124_v46 = vmul.f32 %v200_v44, %v122_v38  ;;  %vm130_vm1 = vweird.f32 %v200_v44 }
  0xab   :  { %vm131_vm3 = vmor %vm129_vm2, %vm130_vm1 }
  0xac   :  { %v125_v48 = vmul.f32 %v200_v44, %v124_v46 }
  0xae   :  { %v126_v50 = vmul.f32 0.5, %v125_v48 }
  0xb0   :  { %v127_v52 = vsub.f32 1.5, %v126_v50 }
  0xb2   :  { %v128_v55 = vmul.f32 %v200_v44, %v127_v52 }
  0xb4   :  { %v132_v57 = vsel %vm131_vm3, %v200_v44, %v128_v55 }
  0xb5   :  { %v133_v58 = vmul.f32 %v132_v57, %v76_v54 }
  0xb7   :  { %v136_v61 = vperm.slane %v133_v58, 0  ;;  %v134_v62 = vmul.f32 %v133_v58, %v117_v29 }
  0xb9   :  { %v135_v0 = vsub.f32 %v77_v60, %v134_v62  ;;  %v137_v1 = vmul.f32 %v136_v61, %v280_v9 }
  0xbb   :  { %v138_v2 = vperm.slane %v135_v0, 0 }
  0xbd   :  { %v139_v3 = vadd.f32 %v138_v2, %v137_v1 }
  0xbf   :  { %v140_v4 = vmax.f32 %v139_v3, 0.0 }
  0xc1   :  { %158 = vmatmul.f32.vlgmr.msra.gmra.mxu1 %v140_v4 }
 0x13e   :  { %v159_v10 = vpop.f32.mrf.mxu1 }
 0x13f   :  { %v160_v11 = vadd.f32 %v197_v8, %v159_v10 }
 0x141   :  { %v162_v12 = vmax.f32 %v160_v11, 0.0 }
 0x143   :  { %180 = vmatmul.f32.vlgmr.msra.gmra.mxu2 %v162_v12 }
 0x1c6   :  { %v181_v14 = vpop.f32.mrf.mxu2 }
 0x1c7   :  { %v182_v15 = vadd.f32 %v198_v13, %v181_v14 }
 0x1c9   :  { %201 = vtanh.f32 %v182_v15 }
 0x1cf   :  { %v202_v9 = vpop.eup %201 }
 0x1d0   :  { %185 = vst [vmem:[%s292_s2] sm:$0xff] %v202_v9 }
 0x1d1   :  { %190 = vsyncpa [#allocation3], 1 }
 0x1d2   :  { %191 = vsyncpa [#allocation5], 1 }

</bundles_post_ra>
